<compile_context>
chip_gen: v7x
topology: tpu7x:2x2x1
jax: 0.10.0
libtpu: 0.0.40
codegen_flags: <defaults>
</compile_context>

<pallas_src>
import jax
import jax.numpy as jnp
from jax.experimental import pallas as pl
from jax.experimental.pallas import tpu as pltpu


def critic_kernel(s_ref, a_ref, w1_ref, b1_ref, w2s_ref, w2a_ref, b2_ref, out_ref):
    # bf16 operands for the MXU, f32 accumulation + f32 elementwise epilogue.
    state = s_ref[...].astype(jnp.bfloat16)        # [TB, S]
    action = a_ref[...].astype(jnp.bfloat16)       # [TB, A]

    # fc1 + ReLU
    h1 = jnp.dot(state, w1_ref[...], preferred_element_type=jnp.float32)
    h1 = jnp.maximum(h1 + b1_ref[...], 0.0)        # f32

    # fc2 on concat([h1, action]) == h1 @ W2_s + action @ W2_a, then ReLU
    z2 = jnp.dot(h1.astype(jnp.bfloat16), w2s_ref[...],
                 preferred_element_type=jnp.float32)
    z2 = z2 + jnp.dot(action, w2a_ref[...], preferred_element_type=jnp.float32)
    z2 = z2 + b2_ref[...]
    out_ref[...] = jnp.maximum(z2, 0.0).astype(out_ref.dtype)
    # TODO(synk): fc_layers loop omitted — it is empty for default fc_units=[256, 128].


def _cdiv(a, b):
    return -(-a // b)


def _round_up(x, m):
    return ((x + m - 1) // m) * m


def _choose_batch_tile(B, block_b, mult=8, max_tile=2048):
    """Adaptive batch tile: big tiles, >=2 grid steps when possible, low padding."""
    n_tiles = max(1, _cdiv(B, block_b))
    if B >= 2 * mult:
        n_tiles = max(n_tiles, 2)          # >=2 grid steps -> both TCs on v7x
    tb = _round_up(_cdiv(B, n_tiles), mult)
    tb = max(mult, min(tb, max_tile))
    return tb


def critic_forward(state, action, params, *, block_b=1024, out_dtype=jnp.float32):
    """Batch-tiled Pallas forward pass for the Critic network."""
    w1t, b1, w2st, w2at, b2 = params
    B, S = state.shape
    A = action.shape[1]
    H1 = w1t.shape[1]
    H2 = w2st.shape[1]

    state = state.astype(jnp.float32)
    action = action.astype(jnp.float32)

    tb = _choose_batch_tile(B, block_b)
    Bp = _round_up(B, tb)
    if Bp != B:
        state = jnp.pad(state, ((0, Bp - B), (0, 0)))
        action = jnp.pad(action, ((0, Bp - B), (0, 0)))

    out = pl.pallas_call(
        critic_kernel,
        out_shape=jax.ShapeDtypeStruct((Bp, H2), out_dtype),
        grid=(Bp // tb,),
        in_specs=[
            pl.BlockSpec((tb, S), lambda i: (i, 0)),     # streamed state tile
            pl.BlockSpec((tb, A), lambda i: (i, 0)),     # streamed action tile
            pl.BlockSpec((S, H1), lambda i: (0, 0)),     # W1^T (bf16, resident)
            pl.BlockSpec((1, H1), lambda i: (0, 0)),     # b1   (f32, resident)
            pl.BlockSpec((H1, H2), lambda i: (0, 0)),    # W2^T state-half (bf16)
            pl.BlockSpec((A, H2), lambda i: (0, 0)),     # W2^T action-half (bf16)
            pl.BlockSpec((1, H2), lambda i: (0, 0)),     # b2   (f32)
        ],
        out_specs=pl.BlockSpec((tb, H2), lambda i: (i, 0)),
        compiler_params=pltpu.CompilerParams(
            dimension_semantics=("parallel",),   # batch axis independent per tile
            vmem_limit_bytes=16 << 20,           # few-MiB footprint; 16 MiB is ample
        ),
    )(state, action, w1t, b1, w2st, w2at, b2)
    return out[:B]


def init_critic_params(key, state_size, action_size, fc_units=(256, 128)):
    """Deterministic init mimicking nn.Linear: U(-1/sqrt(fan_in), 1/sqrt(fan_in)).

    Weights are stored bf16 (MXU-native, half the resident VMEM); biases f32.
    """
    h1, h2 = fc_units
    k1, k2, k3, k4 = jax.random.split(key, 4)

    def uniform(k, shape, fan_in):
        bound = 1.0 / jnp.sqrt(jnp.float32(fan_in))
        return jax.random.uniform(k, shape, jnp.float32, -bound, bound)

    # fc1: [h1, state_size] -> store transposed [state_size, h1]
    w1t = uniform(k1, (state_size, h1), state_size).astype(jnp.bfloat16)
    b1 = uniform(k2, (1, h1), state_size)
    # fc2: [h2, h1 + action_size] -> split & transpose
    w2t = uniform(k3, (h1 + action_size, h2), h1 + action_size)
    b2 = uniform(k4, (1, h2), h1 + action_size)
    w2st = w2t[:h1, :].astype(jnp.bfloat16)
    w2at = w2t[h1:, :].astype(jnp.bfloat16)
    return (w1t, b1, w2st, w2at, b2)


def critic_reference_bf16(state, action, params):
    """Pure-JAX reference mirroring the kernel's bf16-operand / f32-accumulate math."""
    w1t, b1, w2st, w2at, b2 = params
    h1 = jnp.dot(state.astype(jnp.bfloat16), w1t, preferred_element_type=jnp.float32)
    h1 = jnp.maximum(h1 + b1, 0.0)
    z2 = jnp.dot(h1.astype(jnp.bfloat16), w2st, preferred_element_type=jnp.float32)
    z2 = z2 + jnp.dot(action.astype(jnp.bfloat16), w2at,
                      preferred_element_type=jnp.float32)
    return jnp.maximum(z2 + b2, 0.0)


def critic_reference_f32(state, action, params):
    """Pure-f32 reference matching the PyTorch forward (for loose sanity check)."""
    w1t, b1, w2st, w2at, b2 = params
    x = jnp.maximum(state @ w1t.astype(jnp.float32) + b1, 0.0)
    x = jnp.concatenate([x, action], axis=1)
    w2t = jnp.concatenate([w2st, w2at], axis=0).astype(jnp.float32)
    return jnp.maximum(x @ w2t + b2, 0.0)


if __name__ == "__main__":
    batch = 256           # adaptive tiling -> tb=128, 2 grid steps
    state_size = 32
    action_size = 8
    fc_units = (256, 128)

    key = jax.random.PRNGKey(0)
    kp, ks, ka = jax.random.split(key, 3)
    params = init_critic_params(kp, state_size, action_size, fc_units)
    state = jax.random.normal(ks, (batch, state_size), jnp.float32)
    action = jax.random.normal(ka, (batch, action_size), jnp.float32)

    out = critic_forward(state, action, params)
    out = jax.block_until_ready(out)
    assert out.shape == (batch, fc_units[1]), out.shape

    ref_bf16 = critic_reference_bf16(state, action, params)
    assert jnp.allclose(out, ref_bf16, atol=2e-3, rtol=2e-3), "mismatch vs bf16 reference"

    ref_f32 = critic_reference_f32(state, action, params)
    assert jnp.allclose(out, ref_f32, atol=5e-2, rtol=5e-2), "mismatch vs f32 reference"

    print("KERNEL_OK")
</pallas_src>

<mosaic_0001>
module attributes {stable_mosaic.version = 11 : i64} {
  func.func @critic_kernel(%arg0: i32, %arg1: memref<128x32xf32, #tpu.memory_space<vmem>>, %arg2: memref<128x8xf32, #tpu.memory_space<vmem>>, %arg3: memref<32x256xbf16, #tpu.memory_space<vmem>>, %arg4: memref<1x256xf32, #tpu.memory_space<vmem>>, %arg5: memref<256x128xbf16, #tpu.memory_space<vmem>>, %arg6: memref<8x128xbf16, #tpu.memory_space<vmem>>, %arg7: memref<1x128xf32, #tpu.memory_space<vmem>>, %arg8: memref<128x128xf32, #tpu.memory_space<vmem>>) attributes {dimension_semantics = [#tpu.dimension_semantics<parallel>], iteration_bounds = array<i64: 2>, scalar_prefetch = 0 : i64, scratch_operands = 0 : i64, tpu.core_type = #tpu.core_type<tc>, window_params = [{transform_indices = @transform_0, window_bounds = array<i64: 128, 32>}, {transform_indices = @transform_1, window_bounds = array<i64: 128, 8>}, {pipeline_mode = #tpu.pipeline_mode<synchronous>, transform_indices = @transform_2, window_bounds = array<i64: 32, 256>}, {pipeline_mode = #tpu.pipeline_mode<synchronous>, transform_indices = @transform_3, window_bounds = array<i64: 1, 256>}, {pipeline_mode = #tpu.pipeline_mode<synchronous>, transform_indices = @transform_4, window_bounds = array<i64: 256, 128>}, {pipeline_mode = #tpu.pipeline_mode<synchronous>, transform_indices = @transform_5, window_bounds = array<i64: 8, 128>}, {pipeline_mode = #tpu.pipeline_mode<synchronous>, transform_indices = @transform_6, window_bounds = array<i64: 1, 128>}, {transform_indices = @transform_7, window_bounds = array<i64: 128, 128>}]} {
    %c0 = arith.constant 0 : index
    %c0_0 = arith.constant 0 : index
    %0 = vector.load %arg1[%c0, %c0_0] : memref<128x32xf32, #tpu.memory_space<vmem>>, vector<128x32xf32>
    %1 = arith.truncf %0 : vector<128x32xf32> to vector<128x32xbf16>
    %c0_1 = arith.constant 0 : index
    %c0_2 = arith.constant 0 : index
    %2 = vector.load %arg2[%c0_1, %c0_2] : memref<128x8xf32, #tpu.memory_space<vmem>>, vector<128x8xf32>
    %3 = arith.truncf %2 : vector<128x8xf32> to vector<128x8xbf16>
    %c0_3 = arith.constant 0 : index
    %c0_4 = arith.constant 0 : index
    %4 = vector.load %arg3[%c0_3, %c0_4] : memref<32x256xbf16, #tpu.memory_space<vmem>>, vector<32x256xbf16>
    %cst = arith.constant dense<0.000000e+00> : vector<128x256xf32>
    %5 = tpu.matmul %1, %4, %cst {dimension_numbers = #tpu.dot_dimension_numbers<[1], [0], [0], [1], [0, 0, 1, 1], [], []>} : vector<128x32xbf16>, vector<32x256xbf16>, vector<128x256xf32> -> vector<128x256xf32>
    %c0_5 = arith.constant 0 : index
    %c0_6 = arith.constant 0 : index
    %6 = vector.load %arg4[%c0_5, %c0_6] : memref<1x256xf32, #tpu.memory_space<vmem>>, vector<1x256xf32>
    %7 = vector.broadcast %6 : vector<1x256xf32> to vector<128x256xf32>
    %8 = arith.addf %5, %7 : vector<128x256xf32>
    %cst_7 = arith.constant 0.000000e+00 : f32
    %9 = vector.broadcast %cst_7 : f32 to vector<128x256xf32>
    %10 = arith.maximumf %8, %9 : vector<128x256xf32>
    %11 = arith.truncf %10 : vector<128x256xf32> to vector<128x256xbf16>
    %c0_8 = arith.constant 0 : index
    %c0_9 = arith.constant 0 : index
    %12 = vector.load %arg5[%c0_8, %c0_9] : memref<256x128xbf16, #tpu.memory_space<vmem>>, vector<256x128xbf16>
    %cst_10 = arith.constant dense<0.000000e+00> : vector<128x128xf32>
    %13 = tpu.matmul %11, %12, %cst_10 {dimension_numbers = #tpu.dot_dimension_numbers<[1], [0], [0], [1], [0, 0, 1, 1], [], []>} : vector<128x256xbf16>, vector<256x128xbf16>, vector<128x128xf32> -> vector<128x128xf32>
    %c0_11 = arith.constant 0 : index
    %c0_12 = arith.constant 0 : index
    %14 = vector.load %arg6[%c0_11, %c0_12] : memref<8x128xbf16, #tpu.memory_space<vmem>>, vector<8x128xbf16>
    %cst_13 = arith.constant dense<0.000000e+00> : vector<128x128xf32>
    %15 = tpu.matmul %3, %14, %cst_13 {dimension_numbers = #tpu.dot_dimension_numbers<[1], [0], [0], [1], [0, 0, 1, 1], [], []>} : vector<128x8xbf16>, vector<8x128xbf16>, vector<128x128xf32> -> vector<128x128xf32>
    %16 = arith.addf %13, %15 : vector<128x128xf32>
    %c0_14 = arith.constant 0 : index
    %c0_15 = arith.constant 0 : index
    %17 = vector.load %arg7[%c0_14, %c0_15] : memref<1x128xf32, #tpu.memory_space<vmem>>, vector<1x128xf32>
    %18 = vector.broadcast %17 : vector<1x128xf32> to vector<128x128xf32>
    %19 = arith.addf %16, %18 : vector<128x128xf32>
    %cst_16 = arith.constant 0.000000e+00 : f32
    %20 = vector.broadcast %cst_16 : f32 to vector<128x128xf32>
    %21 = arith.maximumf %19, %20 : vector<128x128xf32>
    %c0_17 = arith.constant 0 : index
    %c0_18 = arith.constant 0 : index
    %22 = vector.load %arg8[%c0_17, %c0_18] : memref<128x128xf32, #tpu.memory_space<vmem>>, vector<128x128xf32>
    tpu.vector_store %arg8[%c0_17, %c0_18], %21 {strides = array<i32>} : memref<128x128xf32, #tpu.memory_space<vmem>>, vector<128x128xf32>,
    return
  }
  func.func @transform_0(%arg0: i32) -> (i32, i32) {
    %c0_i32 = arith.constant 0 : i32
    %c0_i32_0 = arith.constant 0 : i32
    return %arg0, %c0_i32 : i32, i32
  }
  func.func @transform_1(%arg0: i32) -> (i32, i32) {
    %c0_i32 = arith.constant 0 : i32
    %c0_i32_0 = arith.constant 0 : i32
    return %arg0, %c0_i32 : i32, i32
  }
  func.func @transform_2(%arg0: i32) -> (i32, i32) {
    %c0_i32 = arith.constant 0 : i32
    %c0_i32_0 = arith.constant 0 : i32
    %c0_i32_1 = arith.constant 0 : i32
    return %c0_i32, %c0_i32_0 : i32, i32
  }
  func.func @transform_3(%arg0: i32) -> (i32, i32) {
    %c0_i32 = arith.constant 0 : i32
    %c0_i32_0 = arith.constant 0 : i32
    %c0_i32_1 = arith.constant 0 : i32
    return %c0_i32, %c0_i32_0 : i32, i32
  }
  func.func @transform_4(%arg0: i32) -> (i32, i32) {
    %c0_i32 = arith.constant 0 : i32
    %c0_i32_0 = arith.constant 0 : i32
    %c0_i32_1 = arith.constant 0 : i32
    return %c0_i32, %c0_i32_0 : i32, i32
  }
  func.func @transform_5(%arg0: i32) -> (i32, i32) {
    %c0_i32 = arith.constant 0 : i32
    %c0_i32_0 = arith.constant 0 : i32
    %c0_i32_1 = arith.constant 0 : i32
    return %c0_i32, %c0_i32_0 : i32, i32
  }
  func.func @transform_6(%arg0: i32) -> (i32, i32) {
    %c0_i32 = arith.constant 0 : i32
    %c0_i32_0 = arith.constant 0 : i32
    %c0_i32_1 = arith.constant 0 : i32
    return %c0_i32, %c0_i32_0 : i32, i32
  }
  func.func @transform_7(%arg0: i32) -> (i32, i32) {
    %c0_i32 = arith.constant 0 : i32
    %c0_i32_0 = arith.constant 0 : i32
    return %arg0, %c0_i32 : i32, i32
  }
}

</mosaic_0001>

<bundles_post_ra>
// kernel: tpu_custom_call.1
= control target key start
LH: loop header
LB: loop body
LE: loop exit
PB: predicated region body
PF: predicated region fallthrough
CT: control target
= control target key end

     0   :  { %12 = vsyncpa [#allocation3], 0  ;;  %s1759_s0 = inlined_call_operand.vmem [shape: f32[256,32], index: 0, kind: input, shape index: {}]   ;;  %s1760_s1 = inlined_call_operand.vmem [shape: f32[256,8], index: 1, kind: input, shape index: {}]   ;;  %s1761_s2 = inlined_call_operand.vmem [shape: bf16[32,256], index: 2, kind: input, shape index: {}]   ;;  %s1762_s3 = inlined_call_operand.vmem [shape: f32[1,256], index: 3, kind: input, shape index: {}]   ;;  %s1763_s4 = inlined_call_operand.vmem [shape: bf16[256,128], index: 4, kind: input, shape index: {}]   ;;  %s1764_s5 = inlined_call_operand.vmem [shape: bf16[8,128], index: 5, kind: input, shape index: {}]   ;;  %s1765_s6 = inlined_call_operand.vmem [shape: f32[1,128], index: 6, kind: input, shape index: {}]   ;;  %s1766_s7 = inlined_call_operand.hbm [shape: f32[256,128], index: 7, kind: output, shape index: {}]  }
   0x1   :  { %14 = vsyncpa [#allocation3 + $0x1], 0  ;;  %s1400_s24 = smov 0   ;;  %s1402_s25 = smov 0  }
   0x2   :  { %s1404_s26 = smov 0   ;;  %s1406_s27 = smov 0  }
   0x3 LB: > { %s1421_s28 = sadd.s32 4294967295, %s1354_s27   ;;  %s1068_s29 = sadd.s32 4294967294, %s1354_s27   ;;  %s1354_s27 = sphi %s1406_s27, %s1772_s27   ;;  %s1350_s26 = sphi %s1404_s26, %s1771_s26   ;;  %s1346_s25 = sphi %s1402_s25, %s1770_s25   ;;  %s1342_s24 = sphi %s1400_s24, %s1769_s24  }
   0x4   : > { %s1425_s30 = sadd.s32 1, %s1354_s27   ;;  %s184_s8 = sadd.s32 1, %s1350_s26 }
   0x5   : > { %s181_s9 = ssub.s32 %s1354_s27, %s1425_s30  ;;  %p194_p0 = scmp.ne.s32.totalorder %s1350_s26, %s1346_s25 }
   0x6   : > { %p182_p1 = scmp.eq.s32.totalorder %s181_s9, 0  ;;  %p195_p2 = scmp.eq.s32.totalorder %s1421_s28, 1 }
   0x7   : > { %p200_p3 = scmp.ne.s32.totalorder %s1346_s25, %s1342_s24  ;;  %p201_p4 = scmp.eq.s32.totalorder %s1068_s29, 1 }
   0x8   : > { %s1436_s10 = scalar_select %p182_p1, %s1350_s26, %s184_s8  }
   0x9   : > { %p1438_p5 = por %p195_p2, %p194_p0  ;;  %p1442_p6 = por %p201_p4, %p200_p3 }
   0xa   : > { %p1071_p7 = scmp.ge.s32.totalorder %s1354_s27, 1  ;;  %p252_p8 = scmp.lt.s32.totalorder %s1354_s27, 3 }
   0xc   : > { %p253_p9 = pnand %p1071_p7, %p252_p8 }
   0xd   : > { %v1270_v0 = vld [vmem:[%s1761_s2 + $0x4] ss:$8 sps:$4 sm:$0xff] (!%p253_p9)   ;;  %s1073_s15 = sshll.u32 (!%p253_p9), %s1421_s28, 4  ;;  %v1272_v1 = vld [vmem:[%s1761_s2] ss:$8 sps:$4 sm:$0xff] (!%p253_p9)   ;;  %v1356_v2 = vmov (!%p253_p9), 0  }
   0xe   : > { %256 = sbr.rel (%p253_p9) target bundleno = 543 (0x21f), region = 48  ;;  %444 = vmatprep.mubr.bf16.mxu0 (!%p253_p9), %v1356_v2  ;;  %p290_p10 = scmp.lt.s32.totalorder (!%p253_p9), %s1073_s15, 31  ;;  %412 = vmatprep.subr.bf16.mxu0 (!%p253_p9), %v1270_v0  ;;  %v1273_v3 = vld [vmem:[%s1761_s2 + $0x14] ss:$8 sps:$4 sm:$0xff] (!%p253_p9)   ;;  %v1275_v4 = vld [vmem:[%s1761_s2 + $0x10] ss:$8 sps:$4 sm:$0xff] (!%p253_p9)  }
   0xf   : > { %413 = vmatpush1.bf16.msra.mxu0 (!%p253_p9), %v1272_v1  ;;  %v605_v5 = vld [vmem:[%s1764_s5] sm:$0xf] (!%p253_p9)  ;;  %vm631_vm0 = vcmask (!%p253_p9), 1043456   ;;  %vm387_vm1 = vcmask (!%p253_p9), 261120   ;;  %v1278_v12 = vld [vmem:[%s1763_s4 + $0x48] sm:$0xff] (!%p253_p9)   ;;  %vm606_vm2 = vcmask (!%p253_p9), 64512  }
  0x10   : > { %414 = vmatprep.subr.bf16.mxu0 (!%p253_p9), %v1273_v3  ;;  %v1276_v6 = vld [vmem:[%s1763_s4 + $0x40] sm:$0xff] (!%p253_p9)   ;;  %1227 = vmatprep.subr.msk.bf16.mxu1 (!%p253_p9), %vm631_vm0, %v605_v5  ;;  %v633_v7 = vsel (!%p253_p9), %vm631_vm0, %v605_v5, 0  ;;  %v1279_v20 = vld [vmem:[%s1763_s4 + $0x8] sm:$0xff] (!%p253_p9)   ;;  %v1280_v23 = vld [vmem:[%s1763_s4 + $0x50] sm:$0xff] (!%p253_p9)   ;;  %s1119_s18 = sshll.u32 (!%p253_p9), %s1421_s28, 11  ;;  %s1357_s23 = smov (!%p253_p9), [#allocation2]  }
  0x11   : > { %1194 = vmatpush3.bf16.msra.mxu1 (!%p253_p9), %v633_v7  ;;  %v1277_v10 = vld [vmem:[%s1763_s4] sm:$0xff] (!%p253_p9)   ;;  %v1281_v24 = vld [vmem:[%s1763_s4 + $0x10] sm:$0xff] (!%p253_p9)   ;;  %v1282_v30 = vld [vmem:[%s1763_s4 + $0x58] sm:$0xff] (!%p253_p9)   ;;  %v357_v7 = vlaneseq (!%p253_p9)  ;;  %s1710_s20 = scalar_lea.hbm (!%p253_p9), %s1766_s7, %s1119_s18  ;;  %s1296_s29 = sshll.u32 (!%p253_p9), %s1357_s23, 4  ;;  %s1297_s29 = int_to_ptr.vmem [resolvable:$false] %s1296_s29 }
  0x12   : > { %1211 = vmatprep.subr.bf16.mxu1 (!%p253_p9), %v1276_v6  ;;  %v1283_v33 = vld [vmem:[%s1763_s4 + $0x18] sm:$0xff] (!%p253_p9)   ;;  %v1284_v35 = vld [vmem:[%s1763_s4 + $0x60] sm:$0xff] (!%p253_p9)   ;;  %v1286_v41 = vld [vmem:[%s1763_s4 + $0x68] sm:$0xff] (!%p253_p9)   ;;  %s1298_s8 = scalar_lea.vmem (!%p253_p9), %s1297_s29, 4096 }
  0x13   : > { %415 = vmatpush1.bf16.msra.mxu0 (!%p253_p9), %v1275_v4  ;;  %v1285_v39 = vld [vmem:[%s1763_s4 + $0x20] sm:$0xff] (!%p253_p9)   ;;  %v1287_v60 = vld [vmem:[%s1763_s4 + $0x28] sm:$0xff] (!%p253_p9)   ;;  %v1288_v61 = vld [vmem:[%s1763_s4 + $0x70] sm:$0xff] (!%p253_p9)  }
  0x14   : > { %1129 = vmatprep.subr.bf16.mxu0 (!%p253_p9), %v1276_v6  ;;  %v1289_v62 = vld [vmem:[%s1763_s4 + $0x30] sm:$0xff] (!%p253_p9)   ;;  %v1291_v6 = vld [vmem:[%s1763_s4 + $0x38] sm:$0xff] (!%p253_p9)  }
  0x15   : > { %s1774_s15 = smov (!%p290_p10, %s1073_s15), 31 }
  0x16   : > { %s1074_s9 = sshll.u32 %s1774_s15, 3 }
  0x17   : > { %s1471_s16 = scalar_lea.vmem %s1759_s0, %s1074_s9  ;;  %s1484_s22 = scalar_lea.vmem %s1760_s1, %s1074_s9 }
  0x18   : > { %v303_v8 = vld [vmem:[%s1471_s16] sm:$0xff]  ;;  %v304_v9 = vld [vmem:[%s1471_s16 + $0x8] sm:$0xff]  ;;  %v305_v13 = vld [vmem:[%s1471_s16 + $0x10] sm:$0xff] }
  0x19   : > { %v319_v11 = vpack.c.bf16 %v304_v9, %v303_v8  ;;  %v306_v14 = vld [vmem:[%s1471_s16 + $0x18] sm:$0xff]  ;;  %v327_v15 = vld [vmem:[%s1484_s22] sm:$0xff]  ;;  %v328_v16 = vld [vmem:[%s1484_s22 + $0x8] sm:$0xff]  ;;  %v358_v8 = vshrl.u32 %v357_v7, 7 }
  0x1a   : > { %v343_v17 = vpack.c.bf16 %v328_v16, %v327_v15  ;;  %v329_v18 = vld [vmem:[%s1484_s22 + $0x10] sm:$0xff]  ;;  %v330_v19 = vld [vmem:[%s1484_s22 + $0x18] sm:$0xff]  ;;  %v320_v21 = vpack.c.bf16 %v306_v14, %v305_v13  ;;  %v331_v25 = vld [vmem:[%s1484_s22 + $0x20] sm:$0xff] }
  0x1b   : > { %1081 = vmatmul.mubr.msk.bf16.vlgmr.msra.gmra.mrb[0].mxu0 %vm387_vm1, %v319_v11  ;;  %v344_v22 = vpack.c.bf16 %v330_v19, %v329_v18  ;;  %v332_v26 = vld [vmem:[%s1484_s22 + $0x28] sm:$0xff]  ;;  %v307_v27 = vld [vmem:[%s1471_s16 + $0x20] sm:$0xff]  ;;  %v333_v31 = vld [vmem:[%s1484_s22 + $0x30] sm:$0xff]  ;;  %v359_v9 = vsub.s32 0, %v358_v8  ;;  %v363_v11 = vsub.s32 1, %v358_v8 }
  0x1c   : > { %454 = vmatprep.mubr.bf16.mxu0 %v1356_v2  ;;  %1130 = vmatpush3.bf16.msra.mxu0 %v1277_v10  ;;  %v308_v28 = vld [vmem:[%s1471_s16 + $0x28] sm:$0xff]  ;;  %v345_v29 = vpack.c.bf16 %v332_v26, %v331_v25  ;;  %v334_v32 = vld [vmem:[%s1484_s22 + $0x38] sm:$0xff]  ;;  %v335_v36 = vld [vmem:[%s1484_s22 + $0x40] sm:$0xff] }
  0x1d   : > { %1131 = vmatprep.subr.bf16.mxu0 %v1278_v12  ;;  %1195 = vmatprep.mubr.msk.bf16.mxu1 %vm606_vm2, %v343_v17  ;;  %v346_v34 = vpack.c.bf16 %v334_v32, %v333_v31  ;;  %v336_v37 = vld [vmem:[%s1484_s22 + $0x48] sm:$0xff]  ;;  %v321_v38 = vpack.c.bf16 %v308_v28, %v307_v27  ;;  %v309_v42 = vld [vmem:[%s1471_s16 + $0x30] sm:$0xff]  ;;  %v310_v43 = vld [vmem:[%s1471_s16 + $0x38] sm:$0xff] }
  0x1e   : > { %1196 = vmatmul.mubr.msk.bf16.vlgmr.msra.gmra.mrb[0].mxu1 %vm606_vm2, %v344_v22  ;;  %v347_v40 = vpack.c.bf16 %v336_v37, %v335_v36  ;;  %v322_v44 = vpack.c.bf16 %v310_v43, %v309_v42  ;;  %v311_v45 = vld [vmem:[%s1471_s16 + $0x40] sm:$0xff]  ;;  %v312_v46 = vld [vmem:[%s1471_s16 + $0x48] sm:$0xff]  ;;  %v313_v48 = vld [vmem:[%s1471_s16 + $0x50] sm:$0xff] }
  0x1f   : > { %1219 = vmatpush3.bf16.msra.mxu1 %v1277_v10  ;;  %1199 = vmatprep.mubr.msk.bf16.mxu1 %vm606_vm2, %v345_v29  ;;  %v323_v47 = vpack.c.bf16 %v312_v46, %v311_v45  ;;  %v314_v49 = vld [vmem:[%s1471_s16 + $0x58] sm:$0xff]  ;;  %v315_v51 = vld [vmem:[%s1471_s16 + $0x60] sm:$0xff]  ;;  %v316_v52 = vld [vmem:[%s1471_s16 + $0x68] sm:$0xff] }
  0x20   : > { %1132 = vmatpush3.bf16.msra.mxu0 %v1279_v20  ;;  %1212 = vmatprep.subr.bf16.mxu1 %v1278_v12  ;;  %v324_v50 = vpack.c.bf16 %v314_v49, %v313_v48  ;;  %v325_v53 = vpack.c.bf16 %v316_v52, %v315_v51  ;;  %v317_v54 = vld [vmem:[%s1471_s16 + $0x70] sm:$0xff]  ;;  %v318_v55 = vld [vmem:[%s1471_s16 + $0x78] sm:$0xff]  ;;  %v339_v63 = vld [vmem:[%s1484_s22 + $0x60] sm:$0xff] }
  0x21   : > { %1133 = vmatprep.subr.bf16.mxu0 %v1280_v23  ;;  %v326_v56 = vpack.c.bf16 %v318_v55, %v317_v54  ;;  %v337_v57 = vld [vmem:[%s1484_s22 + $0x50] sm:$0xff]  ;;  %v338_v58 = vld [vmem:[%s1484_s22 + $0x58] sm:$0xff]  ;;  %v340_v0 = vld [vmem:[%s1484_s22 + $0x68] sm:$0xff] }
  0x22   : > { %v348_v59 = vpack.c.bf16 %v338_v58, %v337_v57  ;;  %v349_v1 = vpack.c.bf16 %v340_v0, %v339_v63  ;;  %v341_v3 = vld [vmem:[%s1484_s22 + $0x70] sm:$0xff]  ;;  %v342_v4 = vld [vmem:[%s1484_s22 + $0x78] sm:$0xff]  ;;  %v355_v10 = vld [vmem:[%s1762_s3] sm:$0x3]  ;;  %s286_s22 = sand.u32 1, %s1346_s25  }
  0x23   : > { %1082 = vmatmul.mubr.msk.bf16.gmra.mrb[4].mxu0 %vm387_vm1, %v320_v21  ;;  %1220 = vmatpush3.bf16.msra.mxu1 %v1279_v20  ;;  %v350_v5 = vpack.c.bf16 %v342_v4, %v341_v3  ;;  %v1581_v12 = vrot.slane %v355_v10, %v359_v9  ;;  %v1583_v13 = vrot.slane %v355_v10, %v363_v11  ;;  %s1072_s14 = sshll.u32 %s286_s22, 7  ;;  %s1718_s21 = scalar_lea.sflag [#allocation3], %s286_s22 }
  0x24   : > { %464 = vmatprep.mubr.bf16.mxu0 %v1356_v2  ;;  %1134 = vmatpush3.bf16.msra.mxu0 %v1281_v24  ;;  %s1661_s17 = scalar_lea.vmem [#allocation2], %s1072_s14 }
  0x25   : > { %1135 = vmatprep.subr.bf16.mxu0 %v1282_v30  ;;  %1213 = vmatprep.subr.bf16.mxu1 %v1280_v23  ;;  %s994_s16 = sshll.u32 %s1661_s17, 4  ;;  %s1712_s16 = int_to_ptr.vmem [resolvable:$true] %s994_s16 }
  0x26   : > { %1200 = vmatmul.mubr.msk.bf16.gmra.mrb[4].mxu1 %vm606_vm2, %v346_v34  ;;  %s1292_s28 = scalar_lea.vmem %s1712_s16, 2048  ;;  %p1299_p0 = scmp.lt.s32.totalorder %s1712_s16, %s1297_s29 }
  0x27   : > { %1221 = vmatpush3.bf16.msra.mxu1 %v1281_v24  ;;  %1203 = vmatprep.mubr.msk.bf16.mxu1 %vm606_vm2, %v347_v40  ;;  %p1293_p11 = scmp.ne.s32.totalorder %s1712_s16, %s1292_s28  ;;  %p1300_p1 = scmp.lt.s32.totalorder %s1298_s8, %s1292_s28 }
  0x28   : > { %1136 = vmatpush3.bf16.msra.mxu0 %v1283_v33  ;;  %1214 = vmatprep.subr.bf16.mxu1 %v1282_v30 }
  0x29   : > { %1137 = vmatprep.subr.bf16.mxu0 %v1284_v35  ;;  %p1294_p12 = pnand %p1293_p11, %p1438_p5  ;;  %p1301_p2 = por %p1300_p1, %p1299_p0 }
  0x2b   : > { %1083 = vmatmul.mubr.msk.bf16.gmra.mrb[8].mxu0 %vm387_vm1, %v321_v38  ;;  %1222 = vmatpush3.bf16.msra.mxu1 %v1283_v33  ;;  %p1295_p13 = pneg %p1294_p12 }
  0x2c   : > { %474 = vmatprep.mubr.bf16.mxu0 %v1356_v2  ;;  %1138 = vmatpush3.bf16.msra.mxu0 %v1285_v39 }
  0x2d   : > { %1139 = vmatprep.subr.bf16.mxu0 %v1286_v41  ;;  %1215 = vmatprep.subr.bf16.mxu1 %v1284_v35  ;;  %p1302_p3 = pnand %p1301_p2, %p1295_p13 }
  0x2e   : > { %1204 = vmatmul.mubr.msk.bf16.gmra.mrb[8].mxu1 %vm606_vm2, %v348_v59 }
  0x2f   : > { %1223 = vmatpush3.bf16.msra.mxu1 %v1285_v39  ;;  %1207 = vmatprep.mubr.msk.bf16.mxu1 %vm606_vm2, %v349_v1 }
  0x30   : > { %1216 = vmatprep.subr.bf16.mxu1 %v1286_v41  ;;  %1140 = vmatpush3.bf16.msra.mxu0 %v1287_v60 }
  0x31   : > { %1141 = vmatprep.subr.bf16.mxu0 %v1288_v61 }
  0x33   : > { %1084 = vmatmul.mubr.msk.bf16.gmra.mrb[12].mxu0 %vm387_vm1, %v322_v44  ;;  %1224 = vmatpush3.bf16.msra.mxu1 %v1287_v60 }
  0x34   : > { %484 = vmatprep.mubr.bf16.mxu0 %v1356_v2  ;;  %1217 = vmatprep.subr.bf16.mxu1 %v1288_v61 }
  0x35   : > { %1142 = vmatpush3.bf16.msra.mxu0 %v1289_v62 }
  0x36   : > { %1208 = vmatmul.mubr.msk.bf16.gmra.mrb[12].mxu1 %vm606_vm2, %v350_v5 }
  0x37   : > { %1225 = vmatpush3.bf16.msra.mxu1 %v1289_v62 }
  0x3b   : > { %1085 = vmatmul.mubr.msk.bf16.gmra.mrb[16].mxu0 %vm387_vm1, %v323_v47 }
  0x3c   : > { %494 = vmatprep.mubr.bf16.mxu0 %v1356_v2 }
  0x43   : > { %1086 = vmatmul.mubr.msk.bf16.gmra.mrb[20].mxu0 %vm387_vm1, %v324_v50 }
  0x44   : > { %504 = vmatprep.mubr.bf16.mxu0 %v1356_v2 }
  0x4b   : > { %1087 = vmatmul.mubr.msk.bf16.gmra.mrb[24].mxu0 %vm387_vm1, %v325_v53 }
  0x4c   : > { %514 = vmatprep.mubr.bf16.mxu0 %v1356_v2  ;;  %v1290_v2 = vld [vmem:[%s1763_s4 + $0x78] sm:$0xff]  }
  0x4d   : > { %1143 = vmatprep.subr.bf16.mxu0 %v1290_v2  ;;  %1218 = vmatprep.subr.bf16.mxu1 %v1290_v2 }
  0x4e   : > { %1144 = vmatpush3.bf16.msra.mxu0 %v1291_v6  ;;  %1226 = vmatpush3.bf16.msra.mxu1 %v1291_v6 }
  0x53   : > { %1088 = vmatmul.mubr.msk.bf16.gmra.mrb[28].mxu0 %vm387_vm1, %v326_v56 }
  0xee   : > { %v446_v14 = vpop.f32.mrb[0].mxu0 }
  0xef   : > { %v447_v15 = vadd.f32 %v446_v14, %v1581_v12  ;;  %v448_v16 = vpop.f32.mrb[1].mxu0 }
  0xf0   : > { %v449_v17 = vadd.f32 %v448_v16, %v1583_v13  ;;  %v450_v18 = vpop.f32.mrb[2].mxu0 }
  0xf1   : > { %v451_v19 = vadd.f32 %v450_v18, %v1581_v12  ;;  %v452_v20 = vpop.f32.mrb[3].mxu0  ;;  %v525_v22 = vmax.f32 %v447_v15, 0.0  ;;  %v1589_v26 = vpop.f32.mrb[0].mxu1 }
  0xf2   : > { %v453_v21 = vadd.f32 %v452_v20, %v1583_v13  ;;  %v526_v24 = vmax.f32 %v449_v17, 0.0  ;;  %v1591_v28 = vpop.f32.mrb[1].mxu1 }
  0xf3   : > { %v527_v23 = vmax.f32 %v451_v19, 0.0  ;;  %v1593_v31 = vpop.f32.mrb[2].mxu1 }
  0xf4   : > { %v528_v25 = vmax.f32 %v453_v21, 0.0  ;;  %v1596_v34 = vpop.f32.mrb[3].mxu1 }
  0xf5   : > { %v557_v27 = vpack.c.bf16 %v527_v23, %v525_v22 }
  0xf6   : > { %v558_v29 = vpack.c.bf16 %v528_v25, %v526_v24  ;;  %v456_v30 = vpop.f32.mrb[4].mxu0 }
  0xf7   : > { %v457_v32 = vadd.f32 %v456_v30, %v1581_v12  ;;  %v458_v33 = vpop.f32.mrb[5].mxu0 }
  0xf8   : > { %v459_v35 = vadd.f32 %v458_v33, %v1583_v13  ;;  %v460_v36 = vpop.f32.mrb[6].mxu0  ;;  %860 = vmatprep.mubr.bf16.mxu0 %v558_v29 }
  0xf9   : > { %v461_v37 = vadd.f32 %v460_v36, %v1581_v12  ;;  %v462_v38 = vpop.f32.mrb[7].mxu0  ;;  %861 = vmatmul.mubr.bf16.vlgmr.msra.gmra.mrb[32].mxu0 %v557_v27  ;;  %v529_v40 = vmax.f32 %v457_v32, 0.0  ;;  %v1601_v44 = vpop.f32.mrb[4].mxu1 }
  0xfa   : > { %v463_v39 = vadd.f32 %v462_v38, %v1583_v13  ;;  %v530_v42 = vmax.f32 %v459_v35, 0.0  ;;  %v1603_v46 = vpop.f32.mrb[5].mxu1 }
  0xfb   : > { %v531_v41 = vmax.f32 %v461_v37, 0.0  ;;  %v1605_v49 = vpop.f32.mrb[6].mxu1 }
  0xfc   : > { %v532_v43 = vmax.f32 %v463_v39, 0.0  ;;  %v1608_v52 = vpop.f32.mrb[7].mxu1 }
  0xfd   : > { %v559_v45 = vpack.c.bf16 %v531_v41, %v529_v40 }
  0xfe   : > { %v560_v47 = vpack.c.bf16 %v532_v43, %v530_v42  ;;  %v466_v48 = vpop.f32.mrb[8].mxu0 }
  0xff   : > { %v467_v50 = vadd.f32 %v466_v48, %v1581_v12  ;;  %v468_v51 = vpop.f32.mrb[9].mxu0 }
 0x100   : > { %v469_v53 = vadd.f32 %v468_v51, %v1583_v13  ;;  %v470_v54 = vpop.f32.mrb[10].mxu0  ;;  %868 = vmatprep.mubr.bf16.mxu1 %v560_v47 }
 0x101   : > { %v471_v55 = vadd.f32 %v470_v54, %v1581_v12  ;;  %v472_v56 = vpop.f32.mrb[11].mxu0  ;;  %869 = vmatmul.mubr.bf16.vlgmr.msra.gmra.mrb[16].mxu1 %v559_v45  ;;  %v533_v58 = vmax.f32 %v467_v50, 0.0 }
 0x102   : > { %v473_v57 = vadd.f32 %v472_v56, %v1583_v13  ;;  %v534_v60 = vmax.f32 %v469_v53, 0.0 }
 0x103   : > { %v535_v59 = vmax.f32 %v471_v55, 0.0 }
 0x104   : > { %v536_v61 = vmax.f32 %v473_v57, 0.0 }
 0x105   : > { %v561_v62 = vpack.c.bf16 %v535_v59, %v533_v58 }
 0x106   : > { %v562_v63 = vpack.c.bf16 %v536_v61, %v534_v60  ;;  %v476_v0 = vpop.f32.mrb[12].mxu0 }
 0x107   : > { %v477_v1 = vadd.f32 %v476_v0, %v1581_v12  ;;  %v478_v2 = vpop.f32.mrb[13].mxu0 }
 0x108   : > { %v479_v3 = vadd.f32 %v478_v2, %v1583_v13  ;;  %v480_v4 = vpop.f32.mrb[14].mxu0  ;;  %876 = vmatprep.mubr.bf16.mxu1 %v562_v63 }
 0x109   : > { %v481_v5 = vadd.f32 %v480_v4, %v1581_v12  ;;  %v482_v6 = vpop.f32.mrb[15].mxu0  ;;  %877 = vmatmul.mubr.bf16.gmra.mrb[20].mxu1 %v561_v62  ;;  %v537_v8 = vmax.f32 %v477_v1, 0.0 }
 0x10a   : > { %v483_v7 = vadd.f32 %v482_v6, %v1583_v13  ;;  %v538_v10 = vmax.f32 %v479_v3, 0.0 }
 0x10b   : > { %v539_v9 = vmax.f32 %v481_v5, 0.0 }
 0x10c   : > { %v540_v11 = vmax.f32 %v483_v7, 0.0 }
 0x10d   : > { %v563_v14 = vpack.c.bf16 %v539_v9, %v537_v8 }
 0x10e   : > { %v564_v15 = vpack.c.bf16 %v540_v11, %v538_v10  ;;  %v486_v16 = vpop.f32.mrb[16].mxu0 }
 0x10f   : > { %v487_v17 = vadd.f32 %v486_v16, %v1581_v12  ;;  %v488_v18 = vpop.f32.mrb[17].mxu0 }
 0x110   : > { %v489_v19 = vadd.f32 %v488_v18, %v1583_v13  ;;  %v490_v20 = vpop.f32.mrb[18].mxu0  ;;  %884 = vmatprep.mubr.bf16.mxu1 %v564_v15  ;;  %v1633_v18 = vpop.f32.mrb[8].mxu1 }
 0x111   : > { %v491_v21 = vadd.f32 %v490_v20, %v1581_v12  ;;  %v492_v22 = vpop.f32.mrb[19].mxu0  ;;  %885 = vmatmul.mubr.bf16.gmra.mrb[24].mxu1 %v563_v14  ;;  %v541_v24 = vmax.f32 %v487_v17, 0.0 }
 0x112   : > { %v493_v23 = vadd.f32 %v492_v22, %v1583_v13  ;;  %v542_v27 = vmax.f32 %v489_v19, 0.0  ;;  %v1635_v19 = vpop.f32.mrb[9].mxu1 }
 0x113   : > { %v543_v25 = vmax.f32 %v491_v21, 0.0  ;;  %v1637_v20 = vpop.f32.mrb[10].mxu1 }
 0x114   : > { %v544_v29 = vmax.f32 %v493_v23, 0.0 }
 0x115   : > { %v565_v30 = vpack.c.bf16 %v543_v25, %v541_v24 }
 0x116   : > { %v566_v32 = vpack.c.bf16 %v544_v29, %v542_v27  ;;  %v496_v33 = vpop.f32.mrb[20].mxu0 }
 0x117   : > { %v497_v35 = vadd.f32 %v496_v33, %v1581_v12  ;;  %v498_v36 = vpop.f32.mrb[21].mxu0 }
 0x118   : > { %v499_v37 = vadd.f32 %v498_v36, %v1583_v13  ;;  %v500_v38 = vpop.f32.mrb[22].mxu0  ;;  %892 = vmatprep.mubr.bf16.mxu1 %v566_v32 }
 0x119   : > { %v501_v39 = vadd.f32 %v500_v38, %v1581_v12  ;;  %v502_v40 = vpop.f32.mrb[23].mxu0  ;;  %893 = vmatmul.mubr.bf16.gmra.mrb[28].mxu1 %v565_v30  ;;  %v545_v42 = vmax.f32 %v497_v35, 0.0  ;;  %v1653_v30 = vld [vmem:[%s1765_s6] ss:$0 sm:$0xff] }
 0x11a   : > { %v503_v41 = vadd.f32 %v502_v40, %v1583_v13  ;;  %v546_v45 = vmax.f32 %v499_v37, 0.0 }
 0x11b   : > { %v547_v43 = vmax.f32 %v501_v39, 0.0 }
 0x11c   : > { %v548_v47 = vmax.f32 %v503_v41, 0.0 }
 0x11d   : > { %v567_v48 = vpack.c.bf16 %v547_v43, %v545_v42 }
 0x11e   : > { %v568_v50 = vpack.c.bf16 %v548_v47, %v546_v45  ;;  %v506_v51 = vpop.f32.mrb[24].mxu0 }
 0x11f   : > { %v507_v53 = vadd.f32 %v506_v51, %v1581_v12  ;;  %v508_v54 = vpop.f32.mrb[25].mxu0 }
 0x120   : > { %v509_v55 = vadd.f32 %v508_v54, %v1583_v13  ;;  %v510_v56 = vpop.f32.mrb[26].mxu0  ;;  %900 = vmatprep.mubr.bf16.mxu1 %v568_v50 }
 0x121   : > { %v511_v57 = vadd.f32 %v510_v56, %v1581_v12  ;;  %v512_v58 = vpop.f32.mrb[27].mxu0  ;;  %901 = vmatmul.mubr.bf16.gmra.mrb[32].mxu1 %v567_v48  ;;  %v549_v60 = vmax.f32 %v507_v53, 0.0 }
 0x122   : > { %v513_v59 = vadd.f32 %v512_v58, %v1583_v13  ;;  %v550_v62 = vmax.f32 %v509_v55, 0.0 }
 0x123   : > { %v551_v61 = vmax.f32 %v511_v57, 0.0 }
 0x124   : > { %v552_v63 = vmax.f32 %v513_v59, 0.0 }
 0x125   : > { %v569_v0 = vpack.c.bf16 %v551_v61, %v549_v60 }
 0x126   : > { %v570_v1 = vpack.c.bf16 %v552_v63, %v550_v62  ;;  %v516_v2 = vpop.f32.mrb[28].mxu0 }
 0x127   : > { %v517_v3 = vadd.f32 %v516_v2, %v1581_v12  ;;  %v518_v4 = vpop.f32.mrb[29].mxu0 }
 0x128   : > { %v519_v5 = vadd.f32 %v518_v4, %v1583_v13  ;;  %v520_v6 = vpop.f32.mrb[30].mxu0  ;;  %908 = vmatprep.mubr.bf16.mxu1 %v570_v1 }
 0x129   : > { %v521_v7 = vadd.f32 %v520_v6, %v1581_v12  ;;  %v522_v8 = vpop.f32.mrb[31].mxu0  ;;  %909 = vmatmul.mubr.bf16.gmra.mrb[36].mxu1 %v569_v0  ;;  %v553_v10 = vmax.f32 %v517_v3, 0.0  ;;  %v1639_v12 = vpop.f32.mrb[11].mxu1 }
 0x12a   : > { %v523_v9 = vadd.f32 %v522_v8, %v1583_v13  ;;  %v554_v14 = vmax.f32 %v519_v5, 0.0  ;;  %v1641_v21 = vpop.f32.mrb[12].mxu1 }
 0x12b   : > { %v555_v11 = vmax.f32 %v521_v7, 0.0  ;;  %v1643_v13 = vpop.f32.mrb[13].mxu1 }
 0x12c   : > { %v556_v15 = vmax.f32 %v523_v9, 0.0  ;;  %v1645_v22 = vpop.f32.mrb[14].mxu1 }
 0x12d   : > { %v571_v16 = vpack.c.bf16 %v555_v11, %v553_v10  ;;  %v1647_v23 = vpop.f32.mrb[15].mxu1 }
 0x12e   : > { %v572_v17 = vpack.c.bf16 %v556_v15, %v554_v14 }
 0x130   : > { %916 = vmatprep.mubr.bf16.mxu1 %v572_v17 }
 0x131   : > { %917 = vmatmul.mubr.bf16.gmra.mrb[40].mxu1 %v571_v16 }
 0x1cc   : > { %v1145_v24 = vpop.f32.mrb[32].mxu0 }
 0x1cd   : > { %v1146_v25 = vpop.f32.mrb[33].mxu0 }
 0x1ce   : > { %v1147_v27 = vadd.f32 %v1146_v25, %v1145_v24  ;;  %v1148_v29 = vpop.f32.mrb[34].mxu0 }
 0x1cf   : > { %v1149_v32 = vpop.f32.mrb[35].mxu0 }
 0x1d0   : > { %v863_v33 = vadd.f32 %v1147_v27, %v1591_v28  ;;  %v1150_v35 = vadd.f32 %v1149_v32, %v1148_v29 }
 0x1d2   : > { %v932_v36 = vadd.f32 %v1653_v30, %v863_v33  ;;  %v866_v37 = vadd.f32 %v1150_v35, %v1596_v34 }
 0x1d4   : > { %v948_v38 = vmax.f32 %v932_v36, 0.0  ;;  %v933_v39 = vadd.f32 %v1653_v30, %v866_v37  ;;  %v1151_v40 = vpop.f32.mrb[16].mxu1 }
 0x1d5   : > { %v1152_v41 = vpop.f32.mrb[17].mxu1 }
 0x1d6   : > { %964 = vst [vmem:[%s1661_s17] sm:$0xff] %v948_v38  ;;  %v949_v42 = vmax.f32 %v933_v39, 0.0  ;;  %v1153_v43 = vadd.f32 %v1152_v41, %v1151_v40  ;;  %v1154_v45 = vpop.f32.mrb[18].mxu1 }
 0x1d7   : > { %v1155_v28 = vpop.f32.mrb[19].mxu1 }
 0x1d8   : > { %965 = vst [vmem:[%s1661_s17 + $0x8] sm:$0xff] %v949_v42  ;;  %v871_v47 = vadd.f32 %v1589_v26, %v1153_v43  ;;  %v1156_v34 = vadd.f32 %v1155_v28, %v1154_v45 }
 0x1da   : > { %v934_v48 = vadd.f32 %v1653_v30, %v871_v47  ;;  %v874_v50 = vadd.f32 %v1593_v31, %v1156_v34 }
 0x1dc   : > { %v950_v51 = vmax.f32 %v934_v48, 0.0  ;;  %v935_v53 = vadd.f32 %v1653_v30, %v874_v50  ;;  %v1157_v54 = vpop.f32.mrb[20].mxu1 }
 0x1dd   : > { %v1158_v55 = vpop.f32.mrb[21].mxu1 }
 0x1de   : > { %966 = vst [vmem:[%s1661_s17 + $0x10] sm:$0xff] %v950_v51  ;;  %v951_v56 = vmax.f32 %v935_v53, 0.0  ;;  %v1159_v57 = vadd.f32 %v1158_v55, %v1157_v54  ;;  %v1160_v58 = vpop.f32.mrb[22].mxu1 }
 0x1df   : > { %v1161_v59 = vpop.f32.mrb[23].mxu1 }
 0x1e0   : > { %967 = vst [vmem:[%s1661_s17 + $0x18] sm:$0xff] %v951_v56  ;;  %v879_v26 = vadd.f32 %v1159_v57, %v1603_v46  ;;  %v1162_v60 = vadd.f32 %v1161_v59, %v1160_v58 }
 0x1e2   : > { %v936_v61 = vadd.f32 %v1653_v30, %v879_v26  ;;  %v882_v31 = vadd.f32 %v1162_v60, %v1608_v52 }
 0x1e4   : > { %v952_v62 = vmax.f32 %v936_v61, 0.0  ;;  %v937_v63 = vadd.f32 %v1653_v30, %v882_v31  ;;  %v1163_v0 = vpop.f32.mrb[24].mxu1 }
 0x1e5   : > { %v1164_v1 = vpop.f32.mrb[25].mxu1 }
 0x1e6   : > { %968 = vst [vmem:[%s1661_s17 + $0x20] sm:$0xff] %v952_v62  ;;  %v953_v2 = vmax.f32 %v937_v63, 0.0  ;;  %v1165_v3 = vadd.f32 %v1164_v1, %v1163_v0  ;;  %v1166_v4 = vpop.f32.mrb[26].mxu1 }
 0x1e7   : > { %v1167_v5 = vpop.f32.mrb[27].mxu1 }
 0x1e8   : > { %969 = vst [vmem:[%s1661_s17 + $0x28] sm:$0xff] %v953_v2  ;;  %v887_v46 = vadd.f32 %v1601_v44, %v1165_v3  ;;  %v1168_v6 = vadd.f32 %v1167_v5, %v1166_v4 }
 0x1ea   : > { %v938_v7 = vadd.f32 %v1653_v30, %v887_v46  ;;  %v890_v52 = vadd.f32 %v1605_v49, %v1168_v6 }
 0x1ec   : > { %v954_v8 = vmax.f32 %v938_v7, 0.0  ;;  %v939_v9 = vadd.f32 %v1653_v30, %v890_v52  ;;  %v1169_v10 = vpop.f32.mrb[28].mxu1 }
 0x1ed   : > { %v1170_v11 = vpop.f32.mrb[29].mxu1 }
 0x1ee   : > { %970 = vst [vmem:[%s1661_s17 + $0x30] sm:$0xff] %v954_v8  ;;  %v955_v14 = vmax.f32 %v939_v9, 0.0  ;;  %v1171_v15 = vadd.f32 %v1170_v11, %v1169_v10  ;;  %v1172_v16 = vpop.f32.mrb[30].mxu1 }
 0x1ef   : > { %v1173_v17 = vpop.f32.mrb[31].mxu1 }
 0x1f0   : > { %971 = vst [vmem:[%s1661_s17 + $0x38] sm:$0xff] %v955_v14  ;;  %v895_v44 = vadd.f32 %v1171_v15, %v1635_v19  ;;  %v1174_v24 = vadd.f32 %v1173_v17, %v1172_v16 }
 0x1f2   : > { %v940_v25 = vadd.f32 %v1653_v30, %v895_v44  ;;  %v898_v49 = vadd.f32 %v1174_v24, %v1639_v12 }
 0x1f4   : > { %v956_v27 = vmax.f32 %v940_v25, 0.0  ;;  %v941_v29 = vadd.f32 %v1653_v30, %v898_v49  ;;  %v1175_v32 = vpop.f32.mrb[32].mxu1 }
 0x1f5   : > { %v1176_v33 = vpop.f32.mrb[33].mxu1 }
 0x1f6   : > { %972 = vst [vmem:[%s1661_s17 + $0x40] sm:$0xff] %v956_v27  ;;  %v957_v35 = vmax.f32 %v941_v29, 0.0  ;;  %v1177_v36 = vadd.f32 %v1176_v33, %v1175_v32  ;;  %v1178_v37 = vpop.f32.mrb[34].mxu1 }
 0x1f7   : > { %v1179_v38 = vpop.f32.mrb[35].mxu1 }
 0x1f8   : > { %973 = vst [vmem:[%s1661_s17 + $0x48] sm:$0xff] %v957_v35  ;;  %v903_v19 = vadd.f32 %v1633_v18, %v1177_v36  ;;  %v1180_v39 = vadd.f32 %v1179_v38, %v1178_v37 }
 0x1fa   : > { %v942_v40 = vadd.f32 %v1653_v30, %v903_v19  ;;  %v906_v12 = vadd.f32 %v1637_v20, %v1180_v39 }
 0x1fc   : > { %v958_v41 = vmax.f32 %v942_v40, 0.0  ;;  %v943_v42 = vadd.f32 %v1653_v30, %v906_v12  ;;  %v1181_v43 = vpop.f32.mrb[36].mxu1 }
 0x1fd   : > { %v1182_v45 = vpop.f32.mrb[37].mxu1 }
 0x1fe   : > { %974 = vst [vmem:[%s1661_s17 + $0x50] sm:$0xff] %v958_v41  ;;  %v959_v28 = vmax.f32 %v943_v42, 0.0  ;;  %v1183_v47 = vadd.f32 %v1182_v45, %v1181_v43  ;;  %v1184_v34 = vpop.f32.mrb[38].mxu1 }
 0x1ff   : > { %v1185_v48 = vpop.f32.mrb[39].mxu1 }
 0x200   : > { %975 = vst [vmem:[%s1661_s17 + $0x58] sm:$0xff] %v959_v28  ;;  %v911_v18 = vadd.f32 %v1183_v47, %v1643_v13  ;;  %v1186_v50 = vadd.f32 %v1185_v48, %v1184_v34 }
 0x202   : > { %v944_v51 = vadd.f32 %v1653_v30, %v911_v18  ;;  %v914_v20 = vadd.f32 %v1186_v50, %v1647_v23 }
 0x204   : > { %v960_v53 = vmax.f32 %v944_v51, 0.0  ;;  %v945_v54 = vadd.f32 %v1653_v30, %v914_v20  ;;  %v1187_v55 = vpop.f32.mrb[40].mxu1 }
 0x205   : > { %v1188_v56 = vpop.f32.mrb[41].mxu1 }
 0x206   : > { %976 = vst [vmem:[%s1661_s17 + $0x60] sm:$0xff] %v960_v53  ;;  %v961_v57 = vmax.f32 %v945_v54, 0.0  ;;  %v1189_v58 = vadd.f32 %v1188_v56, %v1187_v55  ;;  %v1190_v59 = vpop.f32.mrb[42].mxu1 }
 0x207   : > { %v1191_v13 = vpop.f32.mrb[43].mxu1 }
 0x208   : > { %977 = vst [vmem:[%s1661_s17 + $0x68] sm:$0xff] %v961_v57  ;;  %v919_v26 = vadd.f32 %v1641_v21, %v1189_v58  ;;  %v1192_v60 = vadd.f32 %v1191_v13, %v1190_v59 }
 0x20a   : > { %v946_v23 = vadd.f32 %v1653_v30, %v919_v26  ;;  %v922_v61 = vadd.f32 %v1645_v22, %v1192_v60 }
 0x20c   : > { %v962_v31 = vmax.f32 %v946_v23, 0.0  ;;  %v947_v62 = vadd.f32 %v1653_v30, %v922_v61 }
 0x20e   : > { %978 = vst [vmem:[%s1661_s17 + $0x70] sm:$0xff] %v962_v31  ;;  %v963_v21 = vmax.f32 %v947_v62, 0.0 }
 0x210   : > { %979 = vst [vmem:[%s1661_s17 + $0x78] sm:$0xff] %v963_v21 }
 0x211   : > { %1305 = shalt.err (!%p1302_p3)
}
 0x212   : > { %s1306_s22 = scalar_lea.hbm %s1710_s20, 2048  ;;  %s1310_s14 = scalar_lea.hbm %s1766_s7, 4096 }
 0x213   : > { %p1307_p4 = scmp.ne.s32.totalorder %s1710_s20, %s1306_s22  ;;  %p1311_p9 = scmp.lt.u32.totalorder %s1710_s20, %s1766_s7 }
 0x214   : > { %p1312_p10 = scmp.lt.u32.totalorder %s1310_s14, %s1306_s22  ;;  %p1314_p12 = scmp.lt.u32.totalorder %s1306_s22, %s1710_s20 }
 0x215   : > { %p1308_p7 = pnand %p1307_p4, %p1438_p5 }
 0x216   : > { %p1313_p11 = por %p1312_p10, %p1311_p9 }
 0x217   : > { %p1309_p8 = pneg %p1308_p7 }
 0x218   : > { %p1315_p13 = por %p1314_p12, %p1313_p11 }
 0x21a   : > { %p1316_p0 = pnand %p1315_p13, %p1309_p8 }
 0x21c   : > { %1319 = shalt.err (!%p1316_p0)
}
 0x21d   : > { %s1358_s15 = smov 128   ;;  %s1359_s19 = smov 8  }
 0x21e   : > { %1228 = dma.vmem_to_hbm [thread:$0]  (%p1438_p5), %s1712_s16, 2048, %s1710_s20, %s1718_s21, %s1358_s15, %s1358_s15, %s1359_s19  }
 0x21f PF: > { %p1234_p1 = scmp.ge.s32.totalorder %s1354_s27, 2  ;;  %s1009_s28 = sand.u32 1, %s1342_s24  }
 0x220   : > { %s1010_s23 = scalar_lea.sflag [#allocation3], %s1009_s28 }
 0x221   : > { %p1231_p2 = pnand %p1234_p1, %p1442_p6 }
 0x223   : > { %1337 = dma.done.wait (!%p1231_p2), %s1010_s23, 2048  }
 0x224   : > { %1339 = vsyncadd (!%p1231_p2), %s1010_s23, 4294965248  ;;  %p17_p3 = scmp.ge.s32.totalorder %s1425_s30, 4   ;;  %s1769_s24 = smov %s1346_s25 }
 0x225   : > { %s1770_s25 = smov %s1350_s26  ;;  %s1771_s26 = smov %s1436_s10 }
 0x226   : > { %s1772_s27 = smov %s1425_s30  ;;  %19 = sbr.rel (!%p17_p3) target bundleno = 3 (0x3), region = 86 }
 0x22d   :  { %1015 = vsyncpa [#allocation3], 1 }
 0x22e   :  { %1017 = vsyncpa [#allocation3 + $0x1], 1 }

</bundles_post_ra>
